<compile_context>
chip_gen: v5e
topology: v5e:2x2
jax: 0.10.0
libtpu: 0.0.40
codegen_flags: <defaults>
</compile_context>

<pallas_src>
import jax
import jax.numpy as jnp
from jax.experimental import pallas as pl
from jax.experimental.pallas import tpu as pltpu


def _mlp_kernel(x_ref, w1_ref, b1_ref, w2_ref, b2_ref, o_ref):
    # Fused MLP for one batch tile: bf16 MXU matmuls with f32 accumulation,
    # f32 bias+ReLU epilogue, bf16 lane-dense store.
    x = x_ref[...].astype(jnp.bfloat16)                                 # cast in VMEM
    h = jnp.dot(x, w1_ref[...], preferred_element_type=jnp.float32)    # (tile_b, hidden) f32
    h = jnp.maximum(h + b1_ref[...], 0.0).astype(jnp.bfloat16)         # bias + ReLU, back to bf16
    out = jnp.dot(h, w2_ref[...], preferred_element_type=jnp.float32)  # (tile_b, out_pad) f32
    o_ref[...] = (out + b2_ref[...]).astype(o_ref.dtype)               # bf16 unmasked vst


def _round_up(x, m):
    return ((x + m - 1) // m) * m


def _choose_tile_b(B):
    """Batch tile: multiple of 16 (bf16 sublane packing), <=256, bounded padding
    waste, and >=2 grid steps when B allows (v7x 2-TC sharding)."""
    b16 = _round_up(B, 16)
    if b16 <= 128:
        return b16                       # one small tile; nothing worth sharding
    if b16 <= 256:
        return 128                       # guarantees >=2 grid steps
    if (_round_up(B, 256) - B) <= 0.10 * _round_up(B, 256):
        return 256                       # bigger tile, waste still under ~10%
    return 128


def collaboration_net_forward(x, w1, b1, w2, b2):
    """x: (B, channels, dim) float32. w1: (channels*dim, hidden), w2: (hidden, dim).
    Returns (B, dim) float32."""
    B = x.shape[0]
    in_dim, hidden = w1.shape
    out_dim = w2.shape[1]

    # Lane-dense output width (>= 128, multiple of 128).
    out_pad = max(128, _round_up(out_dim, 128))

    # Glue: flatten (nn.Flatten equivalent). x stays f32; cast happens in-kernel.
    x_flat = x.reshape(B, in_dim)

    tile_b = _choose_tile_b(B)
    b_pad = _round_up(B, tile_b)
    if b_pad != B:
        x_flat = jnp.pad(x_flat, ((0, b_pad - B), (0, 0)))

    # Pad fc2 to a lane-dense 128-wide output (padded columns are exact zeros).
    w2_p = jnp.pad(w2, ((0, 0), (0, out_pad - out_dim)))
    b2_p = jnp.pad(b2, ((0, out_pad - out_dim),))

    # bf16 matmul weights (one-time / constant-foldable under jit); biases stay f32.
    w1_bf = w1.astype(jnp.bfloat16)
    w2_bf = w2_p.astype(jnp.bfloat16)
    b1_2d = b1.reshape(1, hidden).astype(jnp.float32)
    b2_2d = b2_p.reshape(1, out_pad).astype(jnp.float32)

    grid = (b_pad // tile_b,)

    cost = pl.CostEstimate(
        flops=2 * b_pad * (in_dim * hidden + hidden * out_pad),
        transcendentals=0,
        bytes_accessed=(
            x_flat.size * 4            # f32 activations in
            + w1_bf.size * 2 + w2_bf.size * 2
            + b1_2d.size * 4 + b2_2d.size * 4
            + b_pad * out_pad * 2      # bf16 output writeback
        ),
    )

    out = pl.pallas_call(
        _mlp_kernel,
        out_shape=jax.ShapeDtypeStruct((b_pad, out_pad), jnp.bfloat16),
        grid_spec=pltpu.PrefetchScalarGridSpec(
            num_scalar_prefetch=0,
            grid=grid,
            in_specs=[
                pl.BlockSpec((tile_b, in_dim), lambda i: (i, 0)),   # streamed f32 x
                pl.BlockSpec((in_dim, hidden), lambda i: (0, 0)),   # W1 resident (bf16)
                pl.BlockSpec((1, hidden), lambda i: (0, 0)),        # b1 resident (f32)
                pl.BlockSpec((hidden, out_pad), lambda i: (0, 0)),  # W2 resident (bf16)
                pl.BlockSpec((1, out_pad), lambda i: (0, 0)),       # b2 resident (f32)
            ],
            out_specs=pl.BlockSpec((tile_b, out_pad), lambda i: (i, 0)),
        ),
        compiler_params=pltpu.CompilerParams(
            dimension_semantics=("parallel",),   # megacore / v7x 2-TC sharding
            vmem_limit_bytes=32 * 1024 * 1024,   # ample headroom; footprint ~1-3 MB
        ),
        cost_estimate=cost,
    )(x_flat, w1_bf, b1_2d, w2_bf, b2_2d)

    # Drop batch padding + lane-padding columns; hand back f32 to the caller.
    return out[:B, :out_dim].astype(jnp.float32)


def init_params(key, channels=4, dim=4, hidden_size=512):
    """Deterministic init mimicking nn.Linear's uniform(-1/sqrt(fan_in), 1/sqrt(fan_in))."""
    in_dim = channels * dim
    k1, k2, k3, k4 = jax.random.split(key, 4)
    bound1 = 1.0 / jnp.sqrt(in_dim)
    bound2 = 1.0 / jnp.sqrt(hidden_size)
    w1 = jax.random.uniform(k1, (in_dim, hidden_size), jnp.float32, -bound1, bound1)
    b1 = jax.random.uniform(k2, (hidden_size,), jnp.float32, -bound1, bound1)
    w2 = jax.random.uniform(k3, (hidden_size, dim), jnp.float32, -bound2, bound2)
    b2 = jax.random.uniform(k4, (dim,), jnp.float32, -bound2, bound2)
    return w1, b1, w2, b2


if __name__ == "__main__":
    channels, dim, hidden_size = 4, 4, 512

    key = jax.random.PRNGKey(0)
    kx_small, kx_big, kp = jax.random.split(key, 3)
    w1, b1, w2, b2 = init_params(kp, channels=channels, dim=dim, hidden_size=hidden_size)

    fwd = jax.jit(collaboration_net_forward)

    def ref_forward(x):
        xf = x.reshape(x.shape[0], channels * dim)
        return jnp.maximum(xf @ w1 + b1, 0.0) @ w2 + b2

    # Small batch (single tile) and a batch that exercises the multi-step grid
    # (tile_b=128, b_pad=256, grid=2) plus batch-padding slicing.
    for batch, k in ((8, kx_small), (200, kx_big)):
        x = jax.random.normal(k, (batch, channels, dim), jnp.float32)
        out = jax.block_until_ready(fwd(x, w1, b1, w2, b2))
        ref = ref_forward(x)
        assert out.shape == (batch, dim)
        # bf16 matmul operands + bf16 output store vs f32 reference -> relaxed tol.
        assert jnp.allclose(out, ref, atol=5e-2, rtol=5e-2), f"mismatch at batch={batch}"

    print("KERNEL_OK")
</pallas_src>

<mosaic_0001>
module attributes {stable_mosaic.version = 11 : i64} {
  func.func @_mlp_kernel(%arg0: i32, %arg1: memref<16x16xf32, #tpu.memory_space<vmem>>, %arg2: memref<16x512xbf16, #tpu.memory_space<vmem>>, %arg3: memref<1x512xf32, #tpu.memory_space<vmem>>, %arg4: memref<512x128xbf16, #tpu.memory_space<vmem>>, %arg5: memref<1x128xf32, #tpu.memory_space<vmem>>, %arg6: memref<16x128xbf16, #tpu.memory_space<vmem>>) attributes {dimension_semantics = [#tpu.dimension_semantics<parallel>], iteration_bounds = array<i64: 1>, scalar_prefetch = 0 : i64, scratch_operands = 0 : i64, tpu.core_type = #tpu.core_type<tc>, window_params = [{transform_indices = @transform_0, window_bounds = array<i64: 16, 16>}, {pipeline_mode = #tpu.pipeline_mode<synchronous>, transform_indices = @transform_1, window_bounds = array<i64: 16, 512>}, {pipeline_mode = #tpu.pipeline_mode<synchronous>, transform_indices = @transform_2, window_bounds = array<i64: 1, 512>}, {pipeline_mode = #tpu.pipeline_mode<synchronous>, transform_indices = @transform_3, window_bounds = array<i64: 512, 128>}, {pipeline_mode = #tpu.pipeline_mode<synchronous>, transform_indices = @transform_4, window_bounds = array<i64: 1, 128>}, {transform_indices = @transform_5, window_bounds = array<i64: 16, 128>}]} {
    %c0 = arith.constant 0 : index
    %c0_0 = arith.constant 0 : index
    %0 = vector.load %arg1[%c0, %c0_0] : memref<16x16xf32, #tpu.memory_space<vmem>>, vector<16x16xf32>
    %1 = arith.truncf %0 : vector<16x16xf32> to vector<16x16xbf16>
    %c0_1 = arith.constant 0 : index
    %c0_2 = arith.constant 0 : index
    %2 = vector.load %arg2[%c0_1, %c0_2] : memref<16x512xbf16, #tpu.memory_space<vmem>>, vector<16x512xbf16>
    %cst = arith.constant dense<0.000000e+00> : vector<16x512xf32>
    %3 = tpu.matmul %1, %2, %cst {dimension_numbers = #tpu.dot_dimension_numbers<[1], [0], [0], [1], [0, 0, 1, 1], [], []>} : vector<16x16xbf16>, vector<16x512xbf16>, vector<16x512xf32> -> vector<16x512xf32>
    %c0_3 = arith.constant 0 : index
    %c0_4 = arith.constant 0 : index
    %4 = vector.load %arg3[%c0_3, %c0_4] : memref<1x512xf32, #tpu.memory_space<vmem>>, vector<1x512xf32>
    %5 = vector.broadcast %4 : vector<1x512xf32> to vector<16x512xf32>
    %6 = arith.addf %3, %5 : vector<16x512xf32>
    %cst_5 = arith.constant 0.000000e+00 : f32
    %7 = vector.broadcast %cst_5 : f32 to vector<16x512xf32>
    %8 = arith.maximumf %6, %7 : vector<16x512xf32>
    %9 = arith.truncf %8 : vector<16x512xf32> to vector<16x512xbf16>
    %c0_6 = arith.constant 0 : index
    %c0_7 = arith.constant 0 : index
    %10 = vector.load %arg4[%c0_6, %c0_7] : memref<512x128xbf16, #tpu.memory_space<vmem>>, vector<512x128xbf16>
    %cst_8 = arith.constant dense<0.000000e+00> : vector<16x128xf32>
    %11 = tpu.matmul %9, %10, %cst_8 {dimension_numbers = #tpu.dot_dimension_numbers<[1], [0], [0], [1], [0, 0, 1, 1], [], []>} : vector<16x512xbf16>, vector<512x128xbf16>, vector<16x128xf32> -> vector<16x128xf32>
    %c0_9 = arith.constant 0 : index
    %c0_10 = arith.constant 0 : index
    %12 = vector.load %arg5[%c0_9, %c0_10] : memref<1x128xf32, #tpu.memory_space<vmem>>, vector<1x128xf32>
    %13 = vector.broadcast %12 : vector<1x128xf32> to vector<16x128xf32>
    %14 = arith.addf %11, %13 : vector<16x128xf32>
    %15 = arith.truncf %14 : vector<16x128xf32> to vector<16x128xbf16>
    %c0_11 = arith.constant 0 : index
    %c0_12 = arith.constant 0 : index
    %16 = vector.load %arg6[%c0_11, %c0_12] : memref<16x128xbf16, #tpu.memory_space<vmem>>, vector<16x128xbf16>
    tpu.vector_store %arg6[%c0_11, %c0_12], %15 {strides = array<i32>} : memref<16x128xbf16, #tpu.memory_space<vmem>>, vector<16x128xbf16>,
    return
  }
  func.func @transform_0(%arg0: i32) -> (i32, i32) {
    %c0_i32 = arith.constant 0 : i32
    %c0_i32_0 = arith.constant 0 : i32
    return %arg0, %c0_i32 : i32, i32
  }
  func.func @transform_1(%arg0: i32) -> (i32, i32) {
    %c0_i32 = arith.constant 0 : i32
    %c0_i32_0 = arith.constant 0 : i32
    %c0_i32_1 = arith.constant 0 : i32
    return %c0_i32, %c0_i32_0 : i32, i32
  }
  func.func @transform_2(%arg0: i32) -> (i32, i32) {
    %c0_i32 = arith.constant 0 : i32
    %c0_i32_0 = arith.constant 0 : i32
    %c0_i32_1 = arith.constant 0 : i32
    return %c0_i32, %c0_i32_0 : i32, i32
  }
  func.func @transform_3(%arg0: i32) -> (i32, i32) {
    %c0_i32 = arith.constant 0 : i32
    %c0_i32_0 = arith.constant 0 : i32
    %c0_i32_1 = arith.constant 0 : i32
    return %c0_i32, %c0_i32_0 : i32, i32
  }
  func.func @transform_4(%arg0: i32) -> (i32, i32) {
    %c0_i32 = arith.constant 0 : i32
    %c0_i32_0 = arith.constant 0 : i32
    %c0_i32_1 = arith.constant 0 : i32
    return %c0_i32, %c0_i32_0 : i32, i32
  }
  func.func @transform_5(%arg0: i32) -> (i32, i32) {
    %c0_i32 = arith.constant 0 : i32
    %c0_i32_0 = arith.constant 0 : i32
    return %arg0, %c0_i32 : i32, i32
  }
}

</mosaic_0001>

<bundles_post_ra>
// kernel: collaboration_net_forward.1
= control target key start
LH: loop header
LB: loop body
LE: loop exit
PB: predicated region body
PF: predicated region fallthrough
CT: control target
= control target key end

     0   :  { %vm58_vm0 = vcmask 130048   ;;  %s813_s1 = inlined_call_operand.vmem [shape: bf16[16,512], index: 1, kind: input, shape index: {}]   ;;  %s814_s0 = inlined_call_operand.vmem [shape: f32[16,16], index: 0, kind: input, shape index: {}]   ;;  %s815_s3 = inlined_call_operand.vmem [shape: bf16[512,128], index: 3, kind: input, shape index: {}]   ;;  %s816_s4 = inlined_call_operand.vmem [shape: f32[1,128], index: 4, kind: input, shape index: {}]   ;;  %s817_s2 = inlined_call_operand.vmem [shape: f32[1,512], index: 2, kind: input, shape index: {}]   ;;  %s818_s5 = inlined_call_operand.vmem [shape: bf16[16,128], index: 5, kind: output, shape index: {}]  }
   0x1   :  { %v456_v0 = vld [vmem:[%s813_s1] sm:$0xf]  ;;  %v604_v1 = vld [vmem:[%s813_s1 + $0xc] sm:$0xf0]  ;;  %v602_v2 = vld [vmem:[%s813_s1 + $0x4] sm:$0xf] }
   0x2   :  { %v457_v3 = vor.u32 %v604_v1, %v456_v0  ;;  %v458_v4 = vld [vmem:[%s813_s1 + $0x10] sm:$0xf0]  ;;  %v464_v5 = vld [vmem:[%s813_s1 + $0x8] sm:$0xf]  ;;  %v605_v6 = vld [vmem:[%s813_s1 + $0x14] sm:$0xf0] }
   0x3   :  { %v461_v7 = vor.u32 %v602_v2, %v458_v4  ;;  %v465_v8 = vor.u32 %v605_v6, %v464_v5  ;;  %v603_v9 = vld [vmem:[%s813_s1 + $0xc] sm:$0xf]  ;;  %v466_v10 = vld [vmem:[%s813_s1 + $0x18] sm:$0xf0]  ;;  %v21_v11 = vld [vmem:[%s814_s0] sm:$0xff] }
   0x4   :  { %69 = vmatpush.bf16.msra.mxu0 %v457_v3  ;;  %v469_v12 = vor.u32 %v603_v9, %v466_v10  ;;  %v22_v13 = vld [vmem:[%s814_s0 + $0x8] sm:$0xff]  ;;  %v613_v14 = vld [vmem:[%s815_s3 + $0x38] sm:$0xff]  ;;  %v612_v18 = vld [vmem:[%s815_s3 + $0x30] sm:$0xff] }
   0x5   :  { %v621_v15 = vld [vmem:[%s815_s3 + $0x78] sm:$0xff]  ;;  %83 = vmatpush.bf16.msra.mxu1 %v461_v7  ;;  %97 = vmatpush.bf16.msra.mxu2 %v465_v8  ;;  %v23_v16 = vpack.c.bf16 %v22_v13, %v21_v11  ;;  %v620_v20 = vld [vmem:[%s815_s3 + $0x70] sm:$0xff]  ;;  %v611_v22 = vld [vmem:[%s815_s3 + $0x28] sm:$0xff] }
   0x6   :  { %v629_v17 = vld [vmem:[%s815_s3 + $0xb8] sm:$0xff]  ;;  %111 = vmatpush.bf16.msra.mxu3 %v469_v12  ;;  %v628_v21 = vld [vmem:[%s815_s3 + $0xb0] sm:$0xff]  ;;  %v619_v24 = vld [vmem:[%s815_s3 + $0x68] sm:$0xff] }
   0x7   :  { %v637_v19 = vld [vmem:[%s815_s3 + $0xf8] sm:$0xff]  ;;  %470 = vmatmul.msk.bf16.vlgmr.msra.gmra.mxu0 %vm58_vm0, %v23_v16  ;;  %v636_v23 = vld [vmem:[%s815_s3 + $0xf0] sm:$0xff]  ;;  %v627_v25 = vld [vmem:[%s815_s3 + $0xa8] sm:$0xff] }
   0x8   :  { %390 = vmatpush.bf16.msrb.mxu0 %v613_v14  ;;  %471 = vmatmul.msk.bf16.vlgmr.msra.gmra.mxu1 %vm58_vm0, %v23_v16  ;;  %v610_v26 = vld [vmem:[%s815_s3 + $0x20] sm:$0xff]  ;;  %v635_v27 = vld [vmem:[%s815_s3 + $0xe8] sm:$0xff]  ;;  %v609_v29 = vld [vmem:[%s815_s3 + $0x18] sm:$0xff] }
   0x9   :  { %404 = vmatpush.bf16.msrb.mxu1 %v621_v15  ;;  %472 = vmatmul.msk.bf16.vlgmr.msra.gmra.mxu2 %vm58_vm0, %v23_v16  ;;  %v618_v28 = vld [vmem:[%s815_s3 + $0x60] sm:$0xff]  ;;  %v617_v30 = vld [vmem:[%s815_s3 + $0x58] sm:$0xff]  ;;  %v608_v33 = vld [vmem:[%s815_s3 + $0x10] sm:$0xff] }
   0xa   :  { %473 = vmatmul.msk.bf16.vlgmr.msra.gmra.mxu3 %vm58_vm0, %v23_v16  ;;  %418 = vmatpush.bf16.msrb.mxu2 %v629_v17  ;;  %v626_v31 = vld [vmem:[%s815_s3 + $0xa0] sm:$0xff]  ;;  %v616_v34 = vld [vmem:[%s815_s3 + $0x50] sm:$0xff]  ;;  %v625_v35 = vld [vmem:[%s815_s3 + $0x98] sm:$0xff] }
   0xb   :  { %432 = vmatpush.bf16.msrb.mxu3 %v637_v19  ;;  %v634_v32 = vld [vmem:[%s815_s3 + $0xe0] sm:$0xff]  ;;  %v633_v36 = vld [vmem:[%s815_s3 + $0xd8] sm:$0xff]  ;;  %v607_v37 = vld [vmem:[%s815_s3 + $0x8] sm:$0xff] }
   0xc   :  { %391 = vmatpush.bf16.msrb.mxu0 %v612_v18  ;;  %v615_v38 = vld [vmem:[%s815_s3 + $0x48] sm:$0xff]  ;;  %v624_v39 = vld [vmem:[%s815_s3 + $0x90] sm:$0xff]  ;;  %v606_v41 = vld [vmem:[%s815_s3] sm:$0xff] }
   0xd   :  { %405 = vmatpush.bf16.msrb.mxu1 %v620_v20  ;;  %v632_v40 = vld [vmem:[%s815_s3 + $0xd0] sm:$0xff]  ;;  %v614_v42 = vld [vmem:[%s815_s3 + $0x40] sm:$0xff]  ;;  %v623_v43 = vld [vmem:[%s815_s3 + $0x88] sm:$0xff] }
   0xe   :  { %419 = vmatpush.bf16.msrb.mxu2 %v628_v21  ;;  %v631_v44 = vld [vmem:[%s815_s3 + $0xc8] sm:$0xff]  ;;  %v622_v45 = vld [vmem:[%s815_s3 + $0x80] sm:$0xff] }
   0xf   :  { %433 = vmatpush.bf16.msrb.mxu3 %v636_v23  ;;  %v630_v46 = vld [vmem:[%s815_s3 + $0xc0] sm:$0xff] }
  0x10   :  { %392 = vmatpush.bf16.msrb.mxu0 %v611_v22  ;;  %v28_v47 = vld [vmem:[%s817_s2] sm:$0xf] }
  0x11   :  { %406 = vmatpush.bf16.msrb.mxu1 %v619_v24  ;;  %v30_v49 = vperm.slane %v28_v47, 0  ;;  %v31_v51 = vperm.slane %v28_v47, 1  ;;  %v32_v61 = vperm.slane %v28_v47, 2  ;;  %v33_v63 = vperm.slane %v28_v47, 3  ;;  %v643_v18 = vld [vmem:[%s816_s4] ss:$0 sm:$0xff] }
  0x12   :  { %420 = vmatpush.bf16.msrb.mxu2 %v627_v25 }
  0x13   :  { %434 = vmatpush.bf16.msrb.mxu3 %v635_v27 }
  0x14   :  { %393 = vmatpush.bf16.msrb.mxu0 %v610_v26 }
  0x15   :  { %407 = vmatpush.bf16.msrb.mxu1 %v618_v28 }
  0x16   :  { %421 = vmatpush.bf16.msrb.mxu2 %v626_v31 }
  0x17   :  { %435 = vmatpush.bf16.msrb.mxu3 %v634_v32 }
  0x18   :  { %394 = vmatpush.bf16.msrb.mxu0 %v609_v29 }
  0x19   :  { %408 = vmatpush.bf16.msrb.mxu1 %v617_v30 }
  0x1a   :  { %422 = vmatpush.bf16.msrb.mxu2 %v625_v35 }
  0x1b   :  { %436 = vmatpush.bf16.msrb.mxu3 %v633_v36 }
  0x1c   :  { %395 = vmatpush.bf16.msrb.mxu0 %v608_v33 }
  0x1d   :  { %409 = vmatpush.bf16.msrb.mxu1 %v616_v34 }
  0x1e   :  { %423 = vmatpush.bf16.msrb.mxu2 %v624_v39 }
  0x1f   :  { %437 = vmatpush.bf16.msrb.mxu3 %v632_v40 }
  0x20   :  { %396 = vmatpush.bf16.msrb.mxu0 %v607_v37 }
  0x21   :  { %410 = vmatpush.bf16.msrb.mxu1 %v615_v38 }
  0x22   :  { %424 = vmatpush.bf16.msrb.mxu2 %v623_v43 }
  0x23   :  { %438 = vmatpush.bf16.msrb.mxu3 %v631_v44 }
  0x24   :  { %397 = vmatpush.bf16.msrb.mxu0 %v606_v41 }
  0x25   :  { %411 = vmatpush.bf16.msrb.mxu1 %v614_v42 }
  0x26   :  { %425 = vmatpush.bf16.msrb.mxu2 %v622_v45 }
  0x27   :  { %439 = vmatpush.bf16.msrb.mxu3 %v630_v46 }
  0x84   :  { %v71_v48 = vpop.f32.mrf.mxu0 }
  0x85   :  { %v85_v50 = vpop.f32.mrf.mxu1  ;;  %v72_v52 = vadd.f32 %v71_v48, %v30_v49 }
  0x86   :  { %v86_v53 = vadd.f32 %v85_v50, %v31_v51 }
  0x87   :  { %v118_v57 = vmax.f32 %v72_v52, 0.0 }
  0x88   :  { %v119_v60 = vmax.f32 %v86_v53, 0.0 }
  0x8c   :  { %v99_v54 = vpop.f32.mrf.mxu2  ;;  %v73_v56 = vpop.f32.mrf.mxu0 }
  0x8d   :  { %v113_v55 = vpop.f32.mrf.mxu3  ;;  %v74_v58 = vadd.f32 %v73_v56, %v30_v49  ;;  %v87_v59 = vpop.f32.mrf.mxu1  ;;  %v100_v3 = vadd.f32 %v99_v54, %v32_v61 }
  0x8e   :  { %v88_v62 = vadd.f32 %v87_v59, %v31_v51  ;;  %v114_v5 = vadd.f32 %v113_v55, %v33_v63 }
  0x8f   :  { %v122_v0 = vmax.f32 %v74_v58, 0.0  ;;  %v120_v10 = vmax.f32 %v100_v3, 0.0 }
  0x90   :  { %v123_v1 = vmax.f32 %v88_v62, 0.0  ;;  %v121_v12 = vmax.f32 %v114_v5, 0.0 }
  0x91   :  { %v126_v2 = vpack.c.bf16 %v122_v0, %v118_v57 }
  0x92   :  { %v127_v4 = vpack.c.bf16 %v123_v1, %v119_v60 }
  0x93   :  { %398 = vmatmul.bf16.vlgmr.msrb.gmra.mxu0 %v126_v2 }
  0x94   :  { %v101_v6 = vpop.f32.mrf.mxu2  ;;  %412 = vmatmul.bf16.vlgmr.msrb.gmra.mxu1 %v127_v4 }
  0x95   :  { %v102_v7 = vadd.f32 %v101_v6, %v32_v61  ;;  %v115_v8 = vpop.f32.mrf.mxu3 }
  0x96   :  { %v116_v9 = vadd.f32 %v115_v8, %v33_v63 }
  0x97   :  { %v124_v11 = vmax.f32 %v102_v7, 0.0 }
  0x98   :  { %v125_v13 = vmax.f32 %v116_v9, 0.0 }
  0x99   :  { %v128_v14 = vpack.c.bf16 %v124_v11, %v120_v10 }
  0x9a   :  { %v129_v15 = vpack.c.bf16 %v125_v13, %v121_v12 }
  0x9b   :  { %426 = vmatmul.bf16.vlgmr.msrb.gmra.mxu2 %v128_v14 }
  0x9c   :  { %440 = vmatmul.bf16.vlgmr.msrb.gmra.mxu3 %v129_v15 }
 0x110   :  { %v399_v16 = vpop.f32.mrf.mxu0 }
 0x111   :  { %v413_v17 = vpop.f32.mrf.mxu1  ;;  %v400_v21 = vadd.f32 %v643_v18, %v399_v16 }
 0x113   :  { %v414_v24 = vadd.f32 %v413_v17, %v400_v21 }
 0x118   :  { %v401_v19 = vpop.f32.mrf.mxu0 }
 0x119   :  { %v402_v23 = vadd.f32 %v643_v18, %v401_v19  ;;  %v415_v25 = vpop.f32.mrf.mxu1 }
 0x11b   :  { %v416_v26 = vadd.f32 %v415_v25, %v402_v23 }
 0x11e   :  { %v427_v20 = vpop.f32.mrf.mxu2 }
 0x11f   :  { %v441_v22 = vpop.f32.mrf.mxu3  ;;  %v428_v27 = vadd.f32 %v427_v20, %v414_v24 }
 0x121   :  { %v442_v31 = vadd.f32 %v441_v22, %v428_v27 }
 0x126   :  { %v429_v28 = vpop.f32.mrf.mxu2 }
 0x127   :  { %v430_v29 = vadd.f32 %v429_v28, %v416_v26  ;;  %v443_v30 = vpop.f32.mrf.mxu3 }
 0x129   :  { %v444_v32 = vadd.f32 %v443_v30, %v430_v29 }
 0x12b   :  { %v641_v33 = vpack.c.bf16 %v444_v32, %v442_v31 }
 0x12d   :  { %642 = vst [vmem:[%s818_s5] sm:$0xff] %v641_v33  }

</bundles_post_ra>
